<compile_context>
chip_gen: v5e
topology: v5e:2x2
jax: 0.10.0
libtpu: 0.0.40
codegen_flags: <defaults>
</compile_context>

<pallas_src>
import functools

import jax
import jax.numpy as jnp
from jax.experimental import pallas as pl
from jax.experimental.pallas import tpu as pltpu

# ---- small synthetic BERT config (stand-in for hidden_dim=768 BERT-base) ----
VOCAB = 100
TYPE_VOCAB = 2
MAX_POS = 64
HIDDEN = 32
HEADS = 4
DH = HIDDEN // HEADS
FFN = 64
LAYERS = 2
EPS = 1e-12          # BERT LayerNorm eps
LANE = 128           # TPU lane width
QKV_PAD = LANE       # fused QKV weight padded from 3*HIDDEN=96 -> 128 (lane dense)


# --------------------------- in-kernel helpers -------------------------------
def _layernorm(x, g, b):
    mu = jnp.mean(x, axis=-1, keepdims=True)
    var = jnp.mean(jnp.square(x - mu), axis=-1, keepdims=True)
    return (x - mu) * jax.lax.rsqrt(var + EPS) * g + b


def _gelu(x):  # exact (erf) gelu, as in BERT
    return 0.5 * x * (1.0 + jax.lax.erf(x * (1.0 / jnp.sqrt(2.0))))


# ---------------------------- Pallas kernels --------------------------------
def _emb_ln_kernel(x_ref, g_ref, b_ref, o_ref):
    o_ref[...] = _layernorm(x_ref[...], g_ref[...], b_ref[...])


def emb_layernorm(x, g, b):
    # x: (M, H), g/b: (H,)
    M, H = x.shape
    return pl.pallas_call(
        _emb_ln_kernel,
        out_shape=jax.ShapeDtypeStruct((M, H), jnp.float32),
        grid=(1,),
        in_specs=[
            pl.BlockSpec((M, H), lambda i: (0, 0)),
            pl.BlockSpec((1, H), lambda i: (0, 0)),
            pl.BlockSpec((1, H), lambda i: (0, 0)),
        ],
        out_specs=pl.BlockSpec((M, H), lambda i: (0, 0)),
    )(x, g.reshape(1, H), b.reshape(1, H))


def _encoder_layer_kernel(
    x_ref, wqkv_ref, bqkv_ref, wo_ref, bo_ref,
    ln1_g_ref, ln1_b_ref, w1_ref, b1_ref, w2_ref, b2_ref,
    ln2_g_ref, ln2_b_ref, o_ref,
):
    # One grid step == one batch element; x is (S, H).
    x = x_ref[...]
    S = x.shape[0]

    # Fused, lane-padded QKV projection: (S, H) @ (H, 128) -> (S, 128).
    qkv = jnp.dot(x, wqkv_ref[...], preferred_element_type=jnp.float32) + bqkv_ref[...]
    q = qkv[:, 0:HIDDEN]
    k = qkv[:, HIDDEN:2 * HIDDEN]
    v = qkv[:, 2 * HIDDEN:3 * HIDDEN]

    # Per-head attention on static lane slices; output projection is accumulated
    # per head:  ctx @ Wo == sum_h ctx_h @ Wo[h*DH:(h+1)*DH, :]  (avoids concat).
    wo = wo_ref[...]
    scale = 1.0 / (DH ** 0.5)
    acc = jnp.zeros((S, HIDDEN), jnp.float32)
    for h in range(HEADS):
        qh = q[:, h * DH:(h + 1) * DH]
        kh = k[:, h * DH:(h + 1) * DH]
        vh = v[:, h * DH:(h + 1) * DH]
        s = jax.lax.dot_general(
            qh, kh, (((1,), (1,)), ((), ())),
            preferred_element_type=jnp.float32) * scale
        s = s - jnp.max(s, axis=-1, keepdims=True)
        p = jnp.exp(s)
        p = p * pl.reciprocal(jnp.sum(p, axis=-1, keepdims=True), approx=True)
        ctx_h = jnp.dot(p, vh, preferred_element_type=jnp.float32)        # (S, DH)
        acc = acc + jnp.dot(ctx_h, wo[h * DH:(h + 1) * DH, :],
                            preferred_element_type=jnp.float32)
    attn_out = acc + bo_ref[...]

    # residual + LN1 (fused)
    x1 = _layernorm(x + attn_out, ln1_g_ref[...], ln1_b_ref[...])

    # FFN with fused GELU epilogue
    hdn = _gelu(jnp.dot(x1, w1_ref[...], preferred_element_type=jnp.float32)
                + b1_ref[...])
    ffn_out = jnp.dot(hdn, w2_ref[...], preferred_element_type=jnp.float32) + b2_ref[...]

    # residual + LN2 (fused)
    o_ref[...] = _layernorm(x1 + ffn_out, ln2_g_ref[...], ln2_b_ref[...])


def encoder_layer(x, lp, B, S):
    # x: (B*S, H) -> (B*S, H); one fused kernel per layer, grid over batch.
    idx_x = lambda b: (b, 0)
    idx_w = lambda b: (0, 0)
    return pl.pallas_call(
        _encoder_layer_kernel,
        out_shape=jax.ShapeDtypeStruct((B * S, HIDDEN), jnp.float32),
        grid=(B,),
        in_specs=[
            pl.BlockSpec((S, HIDDEN), idx_x),          # x (per-batch rows)
            pl.BlockSpec((HIDDEN, QKV_PAD), idx_w),    # wqkv (lane padded)
            pl.BlockSpec((1, QKV_PAD), idx_w),         # bqkv
            pl.BlockSpec((HIDDEN, HIDDEN), idx_w),     # wo
            pl.BlockSpec((1, HIDDEN), idx_w),          # bo
            pl.BlockSpec((1, HIDDEN), idx_w),          # ln1_g
            pl.BlockSpec((1, HIDDEN), idx_w),          # ln1_b
            pl.BlockSpec((HIDDEN, FFN), idx_w),        # w1
            pl.BlockSpec((1, FFN), idx_w),             # b1
            pl.BlockSpec((FFN, HIDDEN), idx_w),        # w2
            pl.BlockSpec((1, HIDDEN), idx_w),          # b2
            pl.BlockSpec((1, HIDDEN), idx_w),          # ln2_g
            pl.BlockSpec((1, HIDDEN), idx_w),          # ln2_b
        ],
        out_specs=pl.BlockSpec((S, HIDDEN), idx_x),
        compiler_params=pltpu.CompilerParams(dimension_semantics=("parallel",)),
    )(x, lp["wqkv"], lp["bqkv"], lp["wo"], lp["bo"],
      lp["ln1_g"], lp["ln1_b"], lp["w1"], lp["b1"],
      lp["w2"], lp["b2"], lp["ln2_g"], lp["ln2_b"])


def _pool_cls_kernel(cls_ref, pw_ref, pb_ref, cw_ref, cb_ref, o_ref):
    # pooler: tanh(W_pool @ h_CLS + b_pool); classifier: lane-padded Linear(H, 1).
    pooled = jnp.tanh(
        jnp.dot(cls_ref[...], pw_ref[...], preferred_element_type=jnp.float32)
        + pb_ref[...])
    o_ref[...] = (jnp.dot(pooled, cw_ref[...], preferred_element_type=jnp.float32)
                  + cb_ref[...])


def pool_classifier(cls_tok, pool_w, pool_b, cls_w_pad, cls_b_pad):
    B, H = cls_tok.shape
    out = pl.pallas_call(
        _pool_cls_kernel,
        out_shape=jax.ShapeDtypeStruct((B, LANE), jnp.float32),
        grid=(1,),
        in_specs=[
            pl.BlockSpec((B, H), lambda i: (0, 0)),
            pl.BlockSpec((H, H), lambda i: (0, 0)),
            pl.BlockSpec((1, H), lambda i: (0, 0)),
            pl.BlockSpec((H, LANE), lambda i: (0, 0)),
            pl.BlockSpec((1, LANE), lambda i: (0, 0)),
        ],
        out_specs=pl.BlockSpec((B, LANE), lambda i: (0, 0)),
    )(cls_tok, pool_w, pool_b, cls_w_pad, cls_b_pad)
    return out[:, :1]  # real logits live in lane 0


# ---------------------------- parameter init --------------------------------
def init_params(key):
    def nrm(k, shape, scale=0.02):
        return scale * jax.random.normal(k, shape, dtype=jnp.float32)

    keys = iter(jax.random.split(key, 16 + LAYERS * 16))
    params = {
        "word_emb": nrm(next(keys), (VOCAB, HIDDEN)),
        "pos_emb": nrm(next(keys), (MAX_POS, HIDDEN)),
        "type_emb": nrm(next(keys), (TYPE_VOCAB, HIDDEN)),
        "emb_ln_g": jnp.ones((HIDDEN,), jnp.float32),
        "emb_ln_b": jnp.zeros((HIDDEN,), jnp.float32),
        "pool_w": nrm(next(keys), (HIDDEN, HIDDEN)),
        "pool_b": jnp.zeros((HIDDEN,), jnp.float32),
        "cls_w": nrm(next(keys), (HIDDEN, 1)),
        "cls_b": jnp.zeros((1,), jnp.float32),
        "layers": [],
    }
    for _ in range(LAYERS):
        params["layers"].append(
            {
                "wq": nrm(next(keys), (HIDDEN, HIDDEN)),
                "bq": jnp.zeros((HIDDEN,), jnp.float32),
                "wk": nrm(next(keys), (HIDDEN, HIDDEN)),
                "bk": jnp.zeros((HIDDEN,), jnp.float32),
                "wv": nrm(next(keys), (HIDDEN, HIDDEN)),
                "bv": jnp.zeros((HIDDEN,), jnp.float32),
                "wo": nrm(next(keys), (HIDDEN, HIDDEN)),
                "bo": jnp.zeros((HIDDEN,), jnp.float32),
                "ln1_g": jnp.ones((HIDDEN,), jnp.float32),
                "ln1_b": jnp.zeros((HIDDEN,), jnp.float32),
                "w1": nrm(next(keys), (HIDDEN, FFN)),
                "b1": jnp.zeros((FFN,), jnp.float32),
                "w2": nrm(next(keys), (FFN, HIDDEN)),
                "b2": jnp.zeros((HIDDEN,), jnp.float32),
                "ln2_g": jnp.ones((HIDDEN,), jnp.float32),
                "ln2_b": jnp.zeros((HIDDEN,), jnp.float32),
            }
        )
    return params


def pack_params(params):
    """Concat Wq/Wk/Wv into one lane-padded weight, lane-pad classifier, reshape biases."""
    packed_layers = []
    for p in params["layers"]:
        wqkv = jnp.concatenate([p["wq"], p["wk"], p["wv"]], axis=1)        # (H, 3H)
        bqkv = jnp.concatenate([p["bq"], p["bk"], p["bv"]], axis=0)        # (3H,)
        wqkv = jnp.pad(wqkv, ((0, 0), (0, QKV_PAD - 3 * HIDDEN)))          # (H, 128)
        bqkv = jnp.pad(bqkv, (0, QKV_PAD - 3 * HIDDEN))                    # (128,)
        packed_layers.append({
            "wqkv": wqkv, "bqkv": bqkv.reshape(1, QKV_PAD),
            "wo": p["wo"], "bo": p["bo"].reshape(1, HIDDEN),
            "ln1_g": p["ln1_g"].reshape(1, HIDDEN),
            "ln1_b": p["ln1_b"].reshape(1, HIDDEN),
            "w1": p["w1"], "b1": p["b1"].reshape(1, FFN),
            "w2": p["w2"], "b2": p["b2"].reshape(1, HIDDEN),
            "ln2_g": p["ln2_g"].reshape(1, HIDDEN),
            "ln2_b": p["ln2_b"].reshape(1, HIDDEN),
        })
    cls_w_pad = jnp.pad(params["cls_w"], ((0, 0), (0, LANE - 1)))          # (H, 128)
    cls_b_pad = jnp.pad(params["cls_b"], (0, LANE - 1))                    # (128,)
    return {
        "layers": packed_layers,
        "pool_w": params["pool_w"],
        "pool_b": params["pool_b"].reshape(1, HIDDEN),
        "cls_w_pad": cls_w_pad,
        "cls_b_pad": cls_b_pad.reshape(1, LANE),
    }


# ------------------------------ forward pass ---------------------------------
def bert_classifier_forward(params, input_ids, token_type_ids=None):
    B, S = input_ids.shape
    if token_type_ids is None:
        token_type_ids = jnp.zeros_like(input_ids)

    # embeddings (gathers are XLA glue; normalization done in a Pallas kernel)
    emb = (
        params["word_emb"][input_ids]
        + params["pos_emb"][jnp.arange(S)][None, :, :]
        + params["type_emb"][token_type_ids]
    )
    x = emb_layernorm(emb.reshape(B * S, HIDDEN),
                      params["emb_ln_g"], params["emb_ln_b"])

    packed = pack_params(params)
    for l in range(LAYERS):
        x = encoder_layer(x, packed["layers"][l], B, S)

    # BertModel(...)[1] == pooler output == tanh(Linear(h_CLS)); classifier == Linear(H, 1)
    cls_tok = x.reshape(B, S, HIDDEN)[:, 0, :]
    logits = pool_classifier(cls_tok, packed["pool_w"], packed["pool_b"],
                             packed["cls_w_pad"], packed["cls_b_pad"])
    return logits  # (B, 1)


if __name__ == "__main__":
    key = jax.random.PRNGKey(0)
    pkey, ikey, tkey = jax.random.split(key, 3)
    params = init_params(pkey)

    B, S = 2, 8
    input_ids = jax.random.randint(ikey, (B, S), 0, VOCAB, dtype=jnp.int32)
    token_type_ids = jax.random.randint(tkey, (B, S), 0, TYPE_VOCAB, dtype=jnp.int32)

    out = bert_classifier_forward(params, input_ids, token_type_ids)
    out = jax.block_until_ready(out)
    assert out.shape == (B, 1) and out.dtype == jnp.float32
    print("KERNEL_OK")
</pallas_src>

<mosaic_0001>
module attributes {stable_mosaic.version = 11 : i64} {
  func.func @_emb_ln_kernel(%arg0: i32, %arg1: memref<16x32xf32, #tpu.memory_space<vmem>>, %arg2: memref<1x32xf32, #tpu.memory_space<vmem>>, %arg3: memref<1x32xf32, #tpu.memory_space<vmem>>, %arg4: memref<16x32xf32, #tpu.memory_space<vmem>>) attributes {dimension_semantics = [#tpu.dimension_semantics<arbitrary>], iteration_bounds = array<i64: 1>, scalar_prefetch = 0 : i64, scratch_operands = 0 : i64, tpu.core_type = #tpu.core_type<tc>, window_params = [{pipeline_mode = #tpu.pipeline_mode<synchronous>, transform_indices = @transform_0, window_bounds = array<i64: 16, 32>}, {pipeline_mode = #tpu.pipeline_mode<synchronous>, transform_indices = @transform_1, window_bounds = array<i64: 1, 32>}, {pipeline_mode = #tpu.pipeline_mode<synchronous>, transform_indices = @transform_2, window_bounds = array<i64: 1, 32>}, {pipeline_mode = #tpu.pipeline_mode<synchronous>, transform_indices = @transform_3, window_bounds = array<i64: 16, 32>}]} {
    %c0 = arith.constant 0 : index
    %c0_0 = arith.constant 0 : index
    %0 = vector.load %arg1[%c0, %c0_0] : memref<16x32xf32, #tpu.memory_space<vmem>>, vector<16x32xf32>
    %c0_1 = arith.constant 0 : index
    %c0_2 = arith.constant 0 : index
    %1 = vector.load %arg2[%c0_1, %c0_2] : memref<1x32xf32, #tpu.memory_space<vmem>>, vector<1x32xf32>
    %c0_3 = arith.constant 0 : index
    %c0_4 = arith.constant 0 : index
    %2 = vector.load %arg3[%c0_3, %c0_4] : memref<1x32xf32, #tpu.memory_space<vmem>>, vector<1x32xf32>
    %cst = arith.constant dense<0.000000e+00> : vector<16xf32>
    %3 = vector.multi_reduction <add>, %0, %cst [1] : vector<16x32xf32> to vector<16xf32>
    %4 = vector.shape_cast %3 : vector<16xf32> to vector<16x1xf32>
    %cst_5 = arith.constant 3.200000e+01 : f32
    %5 = vector.broadcast %cst_5 : f32 to vector<16x1xf32>
    %6 = arith.divf %4, %5 : vector<16x1xf32>
    %7 = vector.broadcast %6 : vector<16x1xf32> to vector<16x32xf32>
    %8 = arith.subf %0, %7 : vector<16x32xf32>
    %9 = arith.mulf %8, %8 : vector<16x32xf32>
    %cst_6 = arith.constant dense<0.000000e+00> : vector<16xf32>
    %10 = vector.multi_reduction <add>, %9, %cst_6 [1] : vector<16x32xf32> to vector<16xf32>
    %11 = vector.shape_cast %10 : vector<16xf32> to vector<16x1xf32>
    %cst_7 = arith.constant 3.200000e+01 : f32
    %12 = vector.broadcast %cst_7 : f32 to vector<16x1xf32>
    %13 = arith.divf %11, %12 : vector<16x1xf32>
    %14 = vector.broadcast %6 : vector<16x1xf32> to vector<16x32xf32>
    %15 = arith.subf %0, %14 : vector<16x32xf32>
    %cst_8 = arith.constant 9.99999996E-13 : f32
    %16 = vector.broadcast %cst_8 : f32 to vector<16x1xf32>
    %17 = arith.addf %13, %16 : vector<16x1xf32>
    %18 = math.rsqrt %17 : vector<16x1xf32>
    %19 = vector.broadcast %18 : vector<16x1xf32> to vector<16x32xf32>
    %20 = arith.mulf %15, %19 : vector<16x32xf32>
    %21 = vector.broadcast %1 : vector<1x32xf32> to vector<16x32xf32>
    %22 = arith.mulf %20, %21 : vector<16x32xf32>
    %23 = vector.broadcast %2 : vector<1x32xf32> to vector<16x32xf32>
    %24 = arith.addf %22, %23 : vector<16x32xf32>
    %c0_9 = arith.constant 0 : index
    %c0_10 = arith.constant 0 : index
    %25 = vector.load %arg4[%c0_9, %c0_10] : memref<16x32xf32, #tpu.memory_space<vmem>>, vector<16x32xf32>
    tpu.vector_store %arg4[%c0_9, %c0_10], %24 {strides = array<i32>} : memref<16x32xf32, #tpu.memory_space<vmem>>, vector<16x32xf32>,
    return
  }
  func.func @transform_0(%arg0: i32) -> (i32, i32) {
    %c0_i32 = arith.constant 0 : i32
    %c0_i32_0 = arith.constant 0 : i32
    %c0_i32_1 = arith.constant 0 : i32
    return %c0_i32, %c0_i32_0 : i32, i32
  }
  func.func @transform_1(%arg0: i32) -> (i32, i32) {
    %c0_i32 = arith.constant 0 : i32
    %c0_i32_0 = arith.constant 0 : i32
    %c0_i32_1 = arith.constant 0 : i32
    return %c0_i32, %c0_i32_0 : i32, i32
  }
  func.func @transform_2(%arg0: i32) -> (i32, i32) {
    %c0_i32 = arith.constant 0 : i32
    %c0_i32_0 = arith.constant 0 : i32
    %c0_i32_1 = arith.constant 0 : i32
    return %c0_i32, %c0_i32_0 : i32, i32
  }
  func.func @transform_3(%arg0: i32) -> (i32, i32) {
    %c0_i32 = arith.constant 0 : i32
    %c0_i32_0 = arith.constant 0 : i32
    %c0_i32_1 = arith.constant 0 : i32
    return %c0_i32, %c0_i32_0 : i32, i32
  }
}

</mosaic_0001>

<bundles_post_ra>
// kernel: tpu_custom_call.1
= control target key start
LH: loop header
LB: loop body
LE: loop exit
PB: predicated region body
PF: predicated region fallthrough
CT: control target
= control target key end

     0   :  { %8 = vsyncpa [#allocation3], 0  ;;  %s275_s0 = inlined_call_operand.hbm [shape: f32[16,32], index: 0, kind: input, shape index: {}]   ;;  %s276_s1 = inlined_call_operand.hbm [shape: f32[1,32], index: 1, kind: input, shape index: {}]   ;;  %s277_s2 = inlined_call_operand.vmem [shape: f32[1,32], index: 2, kind: input, shape index: {}]   ;;  %s278_s3 = inlined_call_operand.hbm [shape: f32[16,32], index: 3, kind: output, shape index: {}]  }
   0x1   :  { %9 = vsyncpa [#allocation6], 0 }
   0x2   :  { %10 = vsyncpa [#allocation4], 0  ;;  %s15_s14 = sshll.u32 %s275_s0, 4  ;;  %s225_s15 = smov [#allocation2]   ;;  %s16_s14 = int_to_ptr.hbm [resolvable:$true] %s15_s14 }
   0x3   :  { %s17_s16 = sshll.u32 %s225_s15, 4  ;;  %s29_s19 = sshll.u32 %s276_s1, 4  ;;  %s18_s16 = int_to_ptr.vmem [resolvable:$true] %s17_s16  ;;  %s30_s19 = int_to_ptr.hbm [resolvable:$true] %s29_s19 }
   0x4   :  { %s226_s20 = smov 128   ;;  %s227_s21 = smov 8  }
   0x5   :  { %23 = dma.hbm_to_vmem [thread:$0]  %s16_s14, 256, %s18_s16, [#allocation3], %s226_s20, %s226_s20, %s227_s21  }
   0x6   :  { %s228_s22 = smov [#allocation5]  }
   0x7   :  { %s31_s23 = sshll.u32 %s228_s22, 4  ;;  %s32_s23 = int_to_ptr.vmem [resolvable:$true] %s31_s23 }
   0x8   :  { %34 = dma.hbm_to_vmem [thread:$0]  %s30_s19, 16, %s32_s23, [#allocation6]  }
   0x9   :  { %219 = dma.done.wait [#allocation3], 256  }
   0xa   :  { %220 = vsyncadd [#allocation3], 4294967040 }
   0xb   :  { %221 = dma.done.wait [#allocation6], 16  }
   0xc   :  { %222 = vsyncadd [#allocation6], 4294967280  ;;  %vm49_vm0 = vcmask 261120   ;;  %v45_v0 = vld [vmem:[#allocation2] sm:$0xff]  ;;  %v46_v2 = vld [vmem:[#allocation2 + $0x8] sm:$0xff]  ;;  %v229_v4 = vmov 32.0  }
   0xd   :  { %v50_v1 = vsel %vm49_vm0, %v45_v0, 0.0  ;;  %v53_v3 = vsel %vm49_vm0, %v46_v2, 0.0  ;;  %141 = vrcp.f32 %v229_v4  ;;  %v139_v35 = vld [vmem:[#allocation5] ss:$0 sm:$0xff]  ;;  %v140_v39 = vld [vmem:[%s277_s2] ss:$0 sm:$0xff] }
   0xe   :  { %51 = vadd.xlane.f32.xlu0 %v50_v1  ;;  %s230_s24 = smov [#allocation7]   ;;  %s119_s28 = sshll.u32 %s278_s3, 4  ;;  %s120_s28 = int_to_ptr.hbm [resolvable:$true] %s119_s28 }
   0xf   :  { %s117_s25 = sshll.u32 %s230_s24, 4  ;;  %s118_s25 = int_to_ptr.vmem [resolvable:$true] %s117_s25 }
  0x13   :  { %v142_v5 = vpop.eup %141 }
  0x14   :  { %v57_v6 = vmul.f32 32.0, %v142_v5  ;;  %vm61_vm1 = vweird.f32 %v142_v5 }
  0x16   :  { %54 = vadd.xlane.f32.xlu0 %v53_v3  ;;  %v58_v7 = vsub.f32 1.0, %v57_v6 }
  0x18   :  { %v59_v8 = vmul.f32 %v142_v5, %v58_v7 }
  0x1a   :  { %v60_v9 = vadd.f32 %v142_v5, %v59_v8 }
  0x1c   :  { %v62_v10 = vsel %vm61_vm1, %v142_v5, %v60_v9 }
  0x81   :  { %v52_v11 = vpop.xlane.xlu0 %51 }
  0x82   :  { %v63_v12 = vmul.f32 %v62_v10, %v52_v11 }
  0x84   :  { %v65_v13 = vsub.f32 %v45_v0, %v63_v12 }
  0x86   :  { %v67_v14 = vmul.f32 %v65_v13, %v65_v13 }
  0x88   :  { %v69_v15 = vsel %vm49_vm0, %v67_v14, 0.0 }
  0x89   :  { %70 = vadd.xlane.f32.xlu1 %v69_v15  ;;  %v55_v16 = vpop.xlane.xlu0 %54 }
  0x8a   :  { %v64_v17 = vmul.f32 %v62_v10, %v55_v16 }
  0x8c   :  { %v66_v18 = vsub.f32 %v46_v2, %v64_v17 }
  0x8e   :  { %v68_v19 = vmul.f32 %v66_v18, %v66_v18 }
  0x90   :  { %v72_v20 = vsel %vm49_vm0, %v68_v19, 0.0 }
  0x91   :  { %73 = vadd.xlane.f32.xlu1 %v72_v20 }
  0xfc   :  { %v71_v21 = vpop.xlane.xlu1 %70 }
  0xfd   :  { %v75_v22 = vmul.f32 %v71_v21, %v62_v10 }
  0xff   :  { %v77_v23 = vadd.f32 1e-12, %v75_v22 }
 0x101   :  { %143 = vrsqrt.f32 %v77_v23  ;;  %vm85_vm3 = vweird.f32 %v77_v23 }
 0x104   :  { %v74_v24 = vpop.xlane.xlu1 %73 }
 0x105   :  { %v76_v25 = vmul.f32 %v74_v24, %v62_v10 }
 0x107   :  { %v144_v26 = vpop.eup %143  ;;  %v78_v27 = vadd.f32 1e-12, %v76_v25 }
 0x108   :  { %v80_v28 = vmul.f32 %v144_v26, %v77_v23  ;;  %vm86_vm2 = vweird.f32 %v144_v26 }
 0x109   :  { %145 = vrsqrt.f32 %v78_v27  ;;  %vm87_vm4 = vmor %vm85_vm3, %vm86_vm2  ;;  %vm95_vm6 = vweird.f32 %v78_v27 }
 0x10a   :  { %v81_v29 = vmul.f32 %v144_v26, %v80_v28 }
 0x10c   :  { %v82_v30 = vmul.f32 0.5, %v81_v29 }
 0x10e   :  { %v83_v31 = vsub.f32 1.5, %v82_v30 }
 0x10f   :  { %v146_v32 = vpop.eup %145 }
 0x110   :  { %v84_v33 = vmul.f32 %v144_v26, %v83_v31  ;;  %v90_v34 = vmul.f32 %v146_v32, %v78_v27  ;;  %vm96_vm5 = vweird.f32 %v146_v32 }
 0x111   :  { %vm97_vm7 = vmor %vm95_vm6, %vm96_vm5 }
 0x112   :  { %v88_v36 = vsel %vm87_vm4, %v144_v26, %v84_v33  ;;  %v91_v37 = vmul.f32 %v146_v32, %v90_v34 }
 0x113   :  { %v99_v38 = vmul.f32 %v88_v36, %v65_v13 }
 0x114   :  { %v92_v40 = vmul.f32 0.5, %v91_v37 }
 0x115   :  { %v104_v41 = vmul.f32 %v139_v35, %v99_v38 }
 0x116   :  { %v93_v42 = vsub.f32 1.5, %v92_v40 }
 0x117   :  { %v109_v43 = vadd.f32 %v140_v39, %v104_v41 }
 0x118   :  { %v94_v44 = vmul.f32 %v146_v32, %v93_v42 }
 0x119   :  { %111 = vst.msk [vmem:[#allocation7] sm:$0xff] %vm49_vm0, %v109_v43 }
 0x11a   :  { %v98_v45 = vsel %vm97_vm7, %v146_v32, %v94_v44 }
 0x11b   :  { %v100_v46 = vmul.f32 %v98_v45, %v66_v18 }
 0x11d   :  { %v105_v47 = vmul.f32 %v139_v35, %v100_v46 }
 0x11f   :  { %v110_v48 = vadd.f32 %v140_v39, %v105_v47 }
 0x121   :  { %112 = vst.msk [vmem:[#allocation7 + $0x8] sm:$0xff] %vm49_vm0, %v110_v48 }
 0x122   :  { %125 = dma.vmem_to_hbm [thread:$0]  %s118_s25, 256, %s120_s28, [#allocation4], %s226_s20, %s226_s20, %s227_s21  }
 0x123   :  { %223 = dma.done.wait [#allocation4], 256  }
 0x124   :  { %224 = vsyncadd [#allocation4], 4294967040 }
 0x125   :  { %130 = vsyncpa [#allocation3], 1 }
 0x126   :  { %131 = vsyncpa [#allocation6], 1 }
 0x127   :  { %132 = vsyncpa [#allocation4], 1 }

</bundles_post_ra>
